<compile_context>
chip_gen: v5e
topology: v5e:2x2
jax: 0.10.0
libtpu: 0.0.40
codegen_flags: <defaults>
</compile_context>

<pallas_src>
import jax
import jax.numpy as jnp
from jax.experimental import pallas as pl
from jax.experimental.pallas import tpu as pltpu


def _round_up(x, m):
    return ((x + m - 1) // m) * m


def _fused_kernel(x_ref, w_ref, bias_ref, o_ref):
    # x_ref: (tm, Cin) bf16, w_ref: (Cin, Nc_pad) bf16 (BN scale pre-folded),
    # bias_ref: (1, Nc_pad) f32, o_ref: (tm, Nc_pad) f32.
    acc = jnp.dot(x_ref[...], w_ref[...], preferred_element_type=jnp.float32)
    o_ref[...] = jnp.maximum(acc + bias_ref[...], 0.0).astype(o_ref.dtype)


def basic_conv2d_transpose_nhwc(x_nhwc, weight, gamma, beta, running_mean,
                                running_var, *, eps=1e-3, stride=2, tm=512):
    """x_nhwc: (N, H, W, Cin).  weight: (Cin, Cout, KH, KW) (PyTorch layout).
    Returns (N, H*KH, W*KW, Cout) float32.  Assumes kernel_size == stride."""
    N, H, W, Cin = x_nhwc.shape
    Cin_w, Cout, KH, KW = weight.shape
    assert Cin_w == Cin
    assert KH == stride and KW == stride, "kernel assumes disjoint 2x2 patches"

    # ---- fold eval-mode BatchNorm into the weight columns / a bias vector ----
    inv_std = jax.lax.rsqrt(running_var.astype(jnp.float32) + eps)
    ch_scale = gamma.astype(jnp.float32) * inv_std                   # (Cout,)
    ch_bias = beta.astype(jnp.float32) - running_mean.astype(jnp.float32) * ch_scale

    # Column order (kh, kw, cout): Cout is lane-minor; scatter stays contiguous.
    w_cols = jnp.transpose(weight, (0, 2, 3, 1)) * ch_scale          # (Cin,KH,KW,Cout)
    Nc = KH * KW * Cout
    Nc_pad = _round_up(Nc, 128)                                      # lane-dense out
    w2d = w_cols.reshape(Cin, Nc)
    bias = jnp.tile(ch_bias, KH * KW)                                # (kh,kw,cout) order
    if Nc_pad != Nc:
        w2d = jnp.pad(w2d, ((0, 0), (0, Nc_pad - Nc)))
        bias = jnp.pad(bias, (0, Nc_pad - Nc))
    bias2d = bias.reshape(1, Nc_pad).astype(jnp.float32)

    # ---- rows = (n, h, w); a free reshape because x is channels-last --------
    M = N * H * W
    tm_eff = max(128, min(tm, _round_up(M, 128)))
    M_pad = _round_up(M, tm_eff)
    x2d = x_nhwc.reshape(M, Cin).astype(jnp.bfloat16)                # bf16 I/O
    if M_pad != M:
        x2d = jnp.pad(x2d, ((0, M_pad - M), (0, 0)))
    w2d = w2d.astype(jnp.bfloat16)

    cost = pl.CostEstimate(
        flops=2 * M_pad * Cin * Nc_pad,
        transcendentals=0,
        bytes_accessed=(M_pad * Cin * 2 + Cin * Nc_pad * 2 + Nc_pad * 4
                        + M_pad * Nc_pad * 4),
    )

    out2d = pl.pallas_call(
        _fused_kernel,
        out_shape=jax.ShapeDtypeStruct((M_pad, Nc_pad), jnp.float32),
        grid_spec=pltpu.PrefetchScalarGridSpec(
            num_scalar_prefetch=0,
            grid=(M_pad // tm_eff,),
            in_specs=[
                pl.BlockSpec((tm_eff, Cin), lambda i: (i, 0)),
                # constant-index tiles: weight (scale folded) and bias
                pl.BlockSpec((Cin, Nc_pad), lambda i: (0, 0)),
                pl.BlockSpec((1, Nc_pad), lambda i: (0, 0)),
            ],
            out_specs=pl.BlockSpec((tm_eff, Nc_pad), lambda i: (i, 0)),
        ),
        compiler_params=pltpu.CompilerParams(
            dimension_semantics=("parallel",),
            vmem_limit_bytes=48 * 1024 * 1024,
        ),
        cost_estimate=cost,
    )(x2d, w2d, bias2d)

    # ---- scatter the disjoint KHxKW patches; (KW, Cout) inner block stays
    # contiguous, so this permute is a cheap strided copy, not a minor-dim
    # transpose. ---------------------------------------------------------------
    y = out2d[:M, :Nc].reshape(N, H, W, KH, KW, Cout)
    y = jnp.transpose(y, (0, 1, 3, 2, 4, 5))                         # (N,H,KH,W,KW,Cout)
    return y.reshape(N, H * KH, W * KW, Cout)


def basic_conv2d_transpose(x, weight, gamma, beta, running_mean, running_var,
                           *, eps=1e-3, stride=2, tm=512):
    """NCHW interface matching the PyTorch module.  Prefer the NHWC entry point
    when the surrounding graph is channels-last (avoids two HBM transposes)."""
    y = basic_conv2d_transpose_nhwc(
        jnp.transpose(x, (0, 2, 3, 1)), weight, gamma, beta, running_mean,
        running_var, eps=eps, stride=stride, tm=tm)
    return jnp.transpose(y, (0, 3, 1, 2))


def _reference(x, weight, gamma, beta, running_mean, running_var, eps=1e-3):
    # straight f32 jnp reference for sanity checking (NCHW)
    N, Cin, H, W = x.shape
    _, Cout, KH, KW = weight.shape
    conv = jnp.einsum("nchw,cokl->nohkwl", x, weight)                # (N,Cout,H,KH,W,KW)
    conv = conv.reshape(N, Cout, H * KH, W * KW)
    inv_std = 1.0 / jnp.sqrt(running_var + eps)
    scale = (gamma * inv_std)[None, :, None, None]
    shift = (beta - running_mean * gamma * inv_std)[None, :, None, None]
    return jnp.maximum(conv * scale + shift, 0.0)


if __name__ == "__main__":
    key = jax.random.PRNGKey(0)
    k_x, k_w, k_g, k_b, k_m, k_v = jax.random.split(key, 6)

    N, Cin, H, W = 2, 4, 16, 16
    Cout, KH, KW = 8, 2, 2  # ConvTranspose2d(4, 8, kernel_size=2, stride=2, bias=False)

    x = jax.random.normal(k_x, (N, Cin, H, W), dtype=jnp.float32)
    weight = jax.random.normal(k_w, (Cin, Cout, KH, KW), dtype=jnp.float32) * 0.1
    gamma = jax.random.normal(k_g, (Cout,), dtype=jnp.float32) * 0.1 + 1.0
    beta = jax.random.normal(k_b, (Cout,), dtype=jnp.float32) * 0.1
    running_mean = jax.random.normal(k_m, (Cout,), dtype=jnp.float32) * 0.1
    running_var = jax.random.uniform(k_v, (Cout,), dtype=jnp.float32,
                                     minval=0.5, maxval=1.5)

    out = basic_conv2d_transpose(x, weight, gamma, beta, running_mean, running_var)
    out = jax.block_until_ready(out)

    ref = _reference(x, weight, gamma, beta, running_mean, running_var)
    assert out.shape == (N, Cout, H * 2, W * 2), out.shape
    # bf16 input/weight streaming => relaxed tolerance vs the f32 reference.
    assert jnp.allclose(out, ref, atol=5e-2, rtol=5e-2), float(
        jnp.max(jnp.abs(out - ref)))

    print("KERNEL_OK")
</pallas_src>

<mosaic_0001>
module attributes {stable_mosaic.version = 11 : i64} {
  func.func @_fused_kernel(%arg0: i32, %arg1: memref<512x4xbf16, #tpu.memory_space<vmem>>, %arg2: memref<4x128xbf16, #tpu.memory_space<vmem>>, %arg3: memref<1x128xf32, #tpu.memory_space<vmem>>, %arg4: memref<512x128xf32, #tpu.memory_space<vmem>>) attributes {dimension_semantics = [#tpu.dimension_semantics<parallel>], iteration_bounds = array<i64: 1>, scalar_prefetch = 0 : i64, scratch_operands = 0 : i64, tpu.core_type = #tpu.core_type<tc>, window_params = [{transform_indices = @transform_0, window_bounds = array<i64: 512, 4>}, {pipeline_mode = #tpu.pipeline_mode<synchronous>, transform_indices = @transform_1, window_bounds = array<i64: 4, 128>}, {pipeline_mode = #tpu.pipeline_mode<synchronous>, transform_indices = @transform_2, window_bounds = array<i64: 1, 128>}, {transform_indices = @transform_3, window_bounds = array<i64: 512, 128>}]} {
    %c0 = arith.constant 0 : index
    %c0_0 = arith.constant 0 : index
    %0 = vector.load %arg1[%c0, %c0_0] : memref<512x4xbf16, #tpu.memory_space<vmem>>, vector<512x4xbf16>
    %c0_1 = arith.constant 0 : index
    %c0_2 = arith.constant 0 : index
    %1 = vector.load %arg2[%c0_1, %c0_2] : memref<4x128xbf16, #tpu.memory_space<vmem>>, vector<4x128xbf16>
    %cst = arith.constant dense<0.000000e+00> : vector<512x128xf32>
    %2 = tpu.matmul %0, %1, %cst {dimension_numbers = #tpu.dot_dimension_numbers<[1], [0], [0], [1], [0, 0, 1, 1], [], []>} : vector<512x4xbf16>, vector<4x128xbf16>, vector<512x128xf32> -> vector<512x128xf32>
    %c0_3 = arith.constant 0 : index
    %c0_4 = arith.constant 0 : index
    %3 = vector.load %arg3[%c0_3, %c0_4] : memref<1x128xf32, #tpu.memory_space<vmem>>, vector<1x128xf32>
    %4 = vector.broadcast %3 : vector<1x128xf32> to vector<512x128xf32>
    %5 = arith.addf %2, %4 : vector<512x128xf32>
    %cst_5 = arith.constant 0.000000e+00 : f32
    %6 = vector.broadcast %cst_5 : f32 to vector<512x128xf32>
    %7 = arith.maximumf %5, %6 : vector<512x128xf32>
    %c0_6 = arith.constant 0 : index
    %c0_7 = arith.constant 0 : index
    %8 = vector.load %arg4[%c0_6, %c0_7] : memref<512x128xf32, #tpu.memory_space<vmem>>, vector<512x128xf32>
    tpu.vector_store %arg4[%c0_6, %c0_7], %7 {strides = array<i32>} : memref<512x128xf32, #tpu.memory_space<vmem>>, vector<512x128xf32>,
    return
  }
  func.func @transform_0(%arg0: i32) -> (i32, i32) {
    %c0_i32 = arith.constant 0 : i32
    %c0_i32_0 = arith.constant 0 : i32
    return %arg0, %c0_i32 : i32, i32
  }
  func.func @transform_1(%arg0: i32) -> (i32, i32) {
    %c0_i32 = arith.constant 0 : i32
    %c0_i32_0 = arith.constant 0 : i32
    %c0_i32_1 = arith.constant 0 : i32
    return %c0_i32, %c0_i32_0 : i32, i32
  }
  func.func @transform_2(%arg0: i32) -> (i32, i32) {
    %c0_i32 = arith.constant 0 : i32
    %c0_i32_0 = arith.constant 0 : i32
    %c0_i32_1 = arith.constant 0 : i32
    return %c0_i32, %c0_i32_0 : i32, i32
  }
  func.func @transform_3(%arg0: i32) -> (i32, i32) {
    %c0_i32 = arith.constant 0 : i32
    %c0_i32_0 = arith.constant 0 : i32
    return %arg0, %c0_i32 : i32, i32
  }
}

</mosaic_0001>

<bundles_post_ra>
// kernel: tpu_custom_call.1
= control target key start
LH: loop header
LB: loop body
LE: loop exit
PB: predicated region body
PF: predicated region fallthrough
CT: control target
= control target key end

     0   :  { %vm342_vm0 = vcmask 1041408   ;;  %vm245_vm1 = vcmask 31744   ;;  %s1112_s0 = inlined_call_operand.vmem [shape: bf16[512,4], index: 0, kind: input, shape index: {}]   ;;  %s1113_s1 = inlined_call_operand.vmem [shape: bf16[4,128], index: 1, kind: input, shape index: {}]   ;;  %s1114_s2 = inlined_call_operand.vmem [shape: f32[1,128], index: 2, kind: input, shape index: {}]   ;;  %s1115_s3 = inlined_call_operand.hbm [shape: f32[512,128], index: 3, kind: output, shape index: {}]  }
   0x1   :  { %v80_v0 = vld [vmem:[%s1113_s1] sm:$0x3] }
   0x2   :  { %v344_v1 = vsel %vm342_vm0, %v80_v0, 0  ;;  %v821_v2 = vld [vmem:[%s1112_s0] sm:$0xff] }
   0x3   :  { %v829_v3 = vld [vmem:[%s1112_s0 + $0x40] sm:$0xff]  ;;  %353 = vmatpush.bf16.msra.mxu0 %v344_v1  ;;  %853 = vmatpush.bf16.msra.mxu1 %v344_v1 }
   0x4   :  { %v837_v4 = vld [vmem:[%s1112_s0 + $0x80] sm:$0xff]  ;;  %854 = vmatpush.bf16.msra.mxu2 %v344_v1  ;;  %855 = vmatpush.bf16.msra.mxu3 %v344_v1 }
   0x5   :  { %v845_v5 = vld [vmem:[%s1112_s0 + $0xc0] sm:$0xff] }
   0x6   :  { %8 = vsyncpa [#allocation3], 0  ;;  %789 = vmatmul.msk.bf16.vlgmr.msra.gmra.mxu0 %vm245_vm1, %v821_v2  ;;  %797 = vmatmul.msk.bf16.vlgmr.msra.gmra.mxu1 %vm245_vm1, %v829_v3  ;;  %v822_v6 = vld [vmem:[%s1112_s0 + $0x8] sm:$0xff]  ;;  %v823_v10 = vld [vmem:[%s1112_s0 + $0x10] sm:$0xff]  ;;  %s649_s25 = sshll.u32 %s1115_s3, 4  ;;  %s887_s26 = smov 128   ;;  %s650_s25 = int_to_ptr.hbm [resolvable:$true] %s649_s25 }
   0x7   :  { %805 = vmatmul.msk.bf16.vlgmr.msra.gmra.mxu2 %vm245_vm1, %v837_v4  ;;  %813 = vmatmul.msk.bf16.vlgmr.msra.gmra.mxu3 %vm245_vm1, %v845_v5  ;;  %v830_v7 = vld [vmem:[%s1112_s0 + $0x48] sm:$0xff]  ;;  %v831_v11 = vld [vmem:[%s1112_s0 + $0x50] sm:$0xff]  ;;  %v824_v14 = vld [vmem:[%s1112_s0 + $0x18] sm:$0xff]  ;;  %s888_s27 = smov 8  }
   0x8   :  { %v838_v8 = vld [vmem:[%s1112_s0 + $0x88] sm:$0xff]  ;;  %v839_v12 = vld [vmem:[%s1112_s0 + $0x90] sm:$0xff]  ;;  %v832_v15 = vld [vmem:[%s1112_s0 + $0x58] sm:$0xff] }
   0x9   :  { %v846_v9 = vld [vmem:[%s1112_s0 + $0xc8] sm:$0xff]  ;;  %v847_v13 = vld [vmem:[%s1112_s0 + $0xd0] sm:$0xff]  ;;  %v840_v16 = vld [vmem:[%s1112_s0 + $0x98] sm:$0xff] }
   0xa   :  { %v848_v17 = vld [vmem:[%s1112_s0 + $0xd8] sm:$0xff]  ;;  %v825_v18 = vld [vmem:[%s1112_s0 + $0x20] sm:$0xff]  ;;  %v826_v22 = vld [vmem:[%s1112_s0 + $0x28] sm:$0xff] }
   0xb   :  { %v833_v19 = vld [vmem:[%s1112_s0 + $0x60] sm:$0xff]  ;;  %v834_v23 = vld [vmem:[%s1112_s0 + $0x68] sm:$0xff]  ;;  %v827_v26 = vld [vmem:[%s1112_s0 + $0x30] sm:$0xff] }
   0xc   :  { %v841_v20 = vld [vmem:[%s1112_s0 + $0xa0] sm:$0xff]  ;;  %v842_v24 = vld [vmem:[%s1112_s0 + $0xa8] sm:$0xff]  ;;  %v835_v27 = vld [vmem:[%s1112_s0 + $0x70] sm:$0xff] }
   0xd   :  { %v849_v21 = vld [vmem:[%s1112_s0 + $0xe0] sm:$0xff]  ;;  %v850_v25 = vld [vmem:[%s1112_s0 + $0xe8] sm:$0xff]  ;;  %v843_v28 = vld [vmem:[%s1112_s0 + $0xb0] sm:$0xff] }
   0xe   :  { %v851_v29 = vld [vmem:[%s1112_s0 + $0xf0] sm:$0xff]  ;;  %v828_v30 = vld [vmem:[%s1112_s0 + $0x38] sm:$0xff]  ;;  %v1043_v34 = vld [vmem:[%s1114_s2] ss:$0 sm:$0xff] }
   0xf   :  { %v836_v31 = vld [vmem:[%s1112_s0 + $0x78] sm:$0xff] }
  0x10   :  { %v844_v32 = vld [vmem:[%s1112_s0 + $0xb8] sm:$0xff] }
  0x11   :  { %v852_v33 = vld [vmem:[%s1112_s0 + $0xf8] sm:$0xff]  ;;  %s886_s0 = smov [#allocation2]  }
  0x12   :  { %s647_s2 = sshll.u32 %s886_s0, 4  ;;  %s648_s2 = int_to_ptr.vmem [resolvable:$true] %s647_s2 }
  0x16   :  { %790 = vmatmul.msk.bf16.gmra.mxu0 %vm245_vm1, %v822_v6  ;;  %798 = vmatmul.msk.bf16.gmra.mxu1 %vm245_vm1, %v830_v7 }
  0x17   :  { %806 = vmatmul.msk.bf16.gmra.mxu2 %vm245_vm1, %v838_v8  ;;  %814 = vmatmul.msk.bf16.gmra.mxu3 %vm245_vm1, %v846_v9 }
  0x26   :  { %791 = vmatmul.msk.bf16.gmra.mxu0 %vm245_vm1, %v823_v10  ;;  %799 = vmatmul.msk.bf16.gmra.mxu1 %vm245_vm1, %v831_v11 }
  0x27   :  { %807 = vmatmul.msk.bf16.gmra.mxu2 %vm245_vm1, %v839_v12  ;;  %815 = vmatmul.msk.bf16.gmra.mxu3 %vm245_vm1, %v847_v13 }
  0x36   :  { %792 = vmatmul.msk.bf16.gmra.mxu0 %vm245_vm1, %v824_v14  ;;  %800 = vmatmul.msk.bf16.gmra.mxu1 %vm245_vm1, %v832_v15 }
  0x37   :  { %808 = vmatmul.msk.bf16.gmra.mxu2 %vm245_vm1, %v840_v16  ;;  %816 = vmatmul.msk.bf16.gmra.mxu3 %vm245_vm1, %v848_v17 }
  0x46   :  { %793 = vmatmul.msk.bf16.gmra.mxu0 %vm245_vm1, %v825_v18  ;;  %801 = vmatmul.msk.bf16.gmra.mxu1 %vm245_vm1, %v833_v19 }
  0x47   :  { %809 = vmatmul.msk.bf16.gmra.mxu2 %vm245_vm1, %v841_v20  ;;  %817 = vmatmul.msk.bf16.gmra.mxu3 %vm245_vm1, %v849_v21 }
  0x56   :  { %794 = vmatmul.msk.bf16.gmra.mxu0 %vm245_vm1, %v826_v22  ;;  %802 = vmatmul.msk.bf16.gmra.mxu1 %vm245_vm1, %v834_v23 }
  0x57   :  { %810 = vmatmul.msk.bf16.gmra.mxu2 %vm245_vm1, %v842_v24  ;;  %818 = vmatmul.msk.bf16.gmra.mxu3 %vm245_vm1, %v850_v25 }
  0x66   :  { %795 = vmatmul.msk.bf16.gmra.mxu0 %vm245_vm1, %v827_v26  ;;  %803 = vmatmul.msk.bf16.gmra.mxu1 %vm245_vm1, %v835_v27 }
  0x67   :  { %811 = vmatmul.msk.bf16.gmra.mxu2 %vm245_vm1, %v843_v28  ;;  %819 = vmatmul.msk.bf16.gmra.mxu3 %vm245_vm1, %v851_v29 }
  0x76   :  { %796 = vmatmul.msk.bf16.gmra.mxu0 %vm245_vm1, %v828_v30  ;;  %804 = vmatmul.msk.bf16.gmra.mxu1 %vm245_vm1, %v836_v31 }
  0x77   :  { %812 = vmatmul.msk.bf16.gmra.mxu2 %vm245_vm1, %v844_v32  ;;  %820 = vmatmul.msk.bf16.gmra.mxu3 %vm245_vm1, %v852_v33 }
  0x83   :  { %v355_v35 = vpop.f32.mrf.mxu0  ;;  %v395_v36 = vpop.f32.mrf.mxu1 }
  0x84   :  { %v356_v37 = vadd.f32 %v1043_v34, %v355_v35  ;;  %v396_v38 = vadd.f32 %v1043_v34, %v395_v36 }
  0x86   :  { %v515_v39 = vmax.f32 %v356_v37, 0.0  ;;  %v531_v40 = vmax.f32 %v396_v38, 0.0 }
  0x88   :  { %579 = vst [vmem:[#allocation2] sm:$0xff] %v515_v39 }
  0x89   :  { %595 = vst [vmem:[#allocation2 + $0x80] sm:$0xff] %v531_v40 }
  0x8a   :  { %v435_v41 = vpop.f32.mrf.mxu2  ;;  %v475_v42 = vpop.f32.mrf.mxu3 }
  0x8b   :  { %v436_v43 = vadd.f32 %v1043_v34, %v435_v41  ;;  %v476_v44 = vadd.f32 %v1043_v34, %v475_v42  ;;  %v357_v45 = vpop.f32.mrf.mxu0  ;;  %v397_v46 = vpop.f32.mrf.mxu1 }
  0x8c   :  { %v358_v47 = vadd.f32 %v1043_v34, %v357_v45  ;;  %v398_v48 = vadd.f32 %v1043_v34, %v397_v46 }
  0x8d   :  { %v547_v49 = vmax.f32 %v436_v43, 0.0  ;;  %v563_v50 = vmax.f32 %v476_v44, 0.0 }
  0x8e   :  { %v516_v51 = vmax.f32 %v358_v47, 0.0  ;;  %v532_v52 = vmax.f32 %v398_v48, 0.0 }
  0x8f   :  { %611 = vst [vmem:[#allocation2 + $0x100] sm:$0xff] %v547_v49 }
  0x90   :  { %627 = vst [vmem:[#allocation2 + $0x180] sm:$0xff] %v563_v50 }
  0x91   :  { %580 = vst [vmem:[#allocation2 + $0x8] sm:$0xff] %v516_v51 }
  0x92   :  { %596 = vst [vmem:[#allocation2 + $0x88] sm:$0xff] %v532_v52  ;;  %v437_v53 = vpop.f32.mrf.mxu2  ;;  %v477_v54 = vpop.f32.mrf.mxu3 }
  0x93   :  { %v438_v55 = vadd.f32 %v1043_v34, %v437_v53  ;;  %v478_v56 = vadd.f32 %v1043_v34, %v477_v54  ;;  %v360_v57 = vpop.f32.mrf.mxu0  ;;  %v400_v58 = vpop.f32.mrf.mxu1 }
  0x94   :  { %v361_v59 = vadd.f32 %v1043_v34, %v360_v57  ;;  %v401_v60 = vadd.f32 %v1043_v34, %v400_v58 }
  0x95   :  { %v548_v61 = vmax.f32 %v438_v55, 0.0  ;;  %v564_v62 = vmax.f32 %v478_v56, 0.0 }
  0x96   :  { %v517_v63 = vmax.f32 %v361_v59, 0.0  ;;  %v533_v0 = vmax.f32 %v401_v60, 0.0 }
  0x97   :  { %612 = vst [vmem:[#allocation2 + $0x108] sm:$0xff] %v548_v61 }
  0x98   :  { %628 = vst [vmem:[#allocation2 + $0x188] sm:$0xff] %v564_v62 }
  0x99   :  { %581 = vst [vmem:[#allocation2 + $0x10] sm:$0xff] %v517_v63 }
  0x9a   :  { %597 = vst [vmem:[#allocation2 + $0x90] sm:$0xff] %v533_v0  ;;  %v440_v1 = vpop.f32.mrf.mxu2  ;;  %v480_v2 = vpop.f32.mrf.mxu3 }
  0x9b   :  { %v441_v3 = vadd.f32 %v1043_v34, %v440_v1  ;;  %v481_v4 = vadd.f32 %v1043_v34, %v480_v2  ;;  %v362_v5 = vpop.f32.mrf.mxu0  ;;  %v402_v6 = vpop.f32.mrf.mxu1 }
  0x9c   :  { %v363_v7 = vadd.f32 %v1043_v34, %v362_v5  ;;  %v403_v8 = vadd.f32 %v1043_v34, %v402_v6 }
  0x9d   :  { %v549_v9 = vmax.f32 %v441_v3, 0.0  ;;  %v565_v10 = vmax.f32 %v481_v4, 0.0 }
  0x9e   :  { %v518_v11 = vmax.f32 %v363_v7, 0.0  ;;  %v534_v12 = vmax.f32 %v403_v8, 0.0 }
  0x9f   :  { %613 = vst [vmem:[#allocation2 + $0x110] sm:$0xff] %v549_v9 }
  0xa0   :  { %629 = vst [vmem:[#allocation2 + $0x190] sm:$0xff] %v565_v10 }
  0xa1   :  { %582 = vst [vmem:[#allocation2 + $0x18] sm:$0xff] %v518_v11 }
  0xa2   :  { %598 = vst [vmem:[#allocation2 + $0x98] sm:$0xff] %v534_v12  ;;  %v442_v13 = vpop.f32.mrf.mxu2  ;;  %v482_v14 = vpop.f32.mrf.mxu3 }
  0xa3   :  { %v443_v15 = vadd.f32 %v1043_v34, %v442_v13  ;;  %v483_v16 = vadd.f32 %v1043_v34, %v482_v14  ;;  %v365_v17 = vpop.f32.mrf.mxu0  ;;  %v405_v18 = vpop.f32.mrf.mxu1 }
  0xa4   :  { %v366_v19 = vadd.f32 %v1043_v34, %v365_v17  ;;  %v406_v20 = vadd.f32 %v1043_v34, %v405_v18 }
  0xa5   :  { %v550_v21 = vmax.f32 %v443_v15, 0.0  ;;  %v566_v22 = vmax.f32 %v483_v16, 0.0 }
  0xa6   :  { %v519_v23 = vmax.f32 %v366_v19, 0.0  ;;  %v535_v24 = vmax.f32 %v406_v20, 0.0 }
  0xa7   :  { %614 = vst [vmem:[#allocation2 + $0x118] sm:$0xff] %v550_v21 }
  0xa8   :  { %630 = vst [vmem:[#allocation2 + $0x198] sm:$0xff] %v566_v22 }
  0xa9   :  { %583 = vst [vmem:[#allocation2 + $0x20] sm:$0xff] %v519_v23 }
  0xaa   :  { %599 = vst [vmem:[#allocation2 + $0xa0] sm:$0xff] %v535_v24  ;;  %v445_v25 = vpop.f32.mrf.mxu2  ;;  %v485_v26 = vpop.f32.mrf.mxu3 }
  0xab   :  { %v446_v27 = vadd.f32 %v1043_v34, %v445_v25  ;;  %v486_v28 = vadd.f32 %v1043_v34, %v485_v26  ;;  %v367_v29 = vpop.f32.mrf.mxu0  ;;  %v407_v30 = vpop.f32.mrf.mxu1 }
  0xac   :  { %v368_v31 = vadd.f32 %v1043_v34, %v367_v29  ;;  %v408_v32 = vadd.f32 %v1043_v34, %v407_v30 }
  0xad   :  { %v551_v33 = vmax.f32 %v446_v27, 0.0  ;;  %v567_v35 = vmax.f32 %v486_v28, 0.0 }
  0xae   :  { %v520_v36 = vmax.f32 %v368_v31, 0.0  ;;  %v536_v37 = vmax.f32 %v408_v32, 0.0 }
  0xaf   :  { %615 = vst [vmem:[#allocation2 + $0x120] sm:$0xff] %v551_v33 }
  0xb0   :  { %631 = vst [vmem:[#allocation2 + $0x1a0] sm:$0xff] %v567_v35 }
  0xb1   :  { %584 = vst [vmem:[#allocation2 + $0x28] sm:$0xff] %v520_v36 }
  0xb2   :  { %600 = vst [vmem:[#allocation2 + $0xa8] sm:$0xff] %v536_v37  ;;  %v447_v38 = vpop.f32.mrf.mxu2  ;;  %v487_v39 = vpop.f32.mrf.mxu3 }
  0xb3   :  { %v448_v40 = vadd.f32 %v1043_v34, %v447_v38  ;;  %v488_v41 = vadd.f32 %v1043_v34, %v487_v39  ;;  %v370_v42 = vpop.f32.mrf.mxu0  ;;  %v410_v43 = vpop.f32.mrf.mxu1 }
  0xb4   :  { %v371_v44 = vadd.f32 %v1043_v34, %v370_v42  ;;  %v411_v45 = vadd.f32 %v1043_v34, %v410_v43 }
  0xb5   :  { %v552_v46 = vmax.f32 %v448_v40, 0.0  ;;  %v568_v47 = vmax.f32 %v488_v41, 0.0 }
  0xb6   :  { %v521_v48 = vmax.f32 %v371_v44, 0.0  ;;  %v537_v49 = vmax.f32 %v411_v45, 0.0 }
  0xb7   :  { %616 = vst [vmem:[#allocation2 + $0x128] sm:$0xff] %v552_v46 }
  0xb8   :  { %632 = vst [vmem:[#allocation2 + $0x1a8] sm:$0xff] %v568_v47 }
  0xb9   :  { %585 = vst [vmem:[#allocation2 + $0x30] sm:$0xff] %v521_v48 }
  0xba   :  { %601 = vst [vmem:[#allocation2 + $0xb0] sm:$0xff] %v537_v49  ;;  %v450_v50 = vpop.f32.mrf.mxu2  ;;  %v490_v51 = vpop.f32.mrf.mxu3 }
  0xbb   :  { %v451_v52 = vadd.f32 %v1043_v34, %v450_v50  ;;  %v491_v53 = vadd.f32 %v1043_v34, %v490_v51  ;;  %v372_v54 = vpop.f32.mrf.mxu0  ;;  %v412_v55 = vpop.f32.mrf.mxu1 }
  0xbc   :  { %v373_v56 = vadd.f32 %v1043_v34, %v372_v54  ;;  %v413_v57 = vadd.f32 %v1043_v34, %v412_v55 }
  0xbd   :  { %v553_v58 = vmax.f32 %v451_v52, 0.0  ;;  %v569_v59 = vmax.f32 %v491_v53, 0.0 }
  0xbe   :  { %v522_v60 = vmax.f32 %v373_v56, 0.0  ;;  %v538_v61 = vmax.f32 %v413_v57, 0.0 }
  0xbf   :  { %617 = vst [vmem:[#allocation2 + $0x130] sm:$0xff] %v553_v58 }
  0xc0   :  { %633 = vst [vmem:[#allocation2 + $0x1b0] sm:$0xff] %v569_v59 }
  0xc1   :  { %586 = vst [vmem:[#allocation2 + $0x38] sm:$0xff] %v522_v60 }
  0xc2   :  { %602 = vst [vmem:[#allocation2 + $0xb8] sm:$0xff] %v538_v61  ;;  %v452_v62 = vpop.f32.mrf.mxu2  ;;  %v492_v63 = vpop.f32.mrf.mxu3 }
  0xc3   :  { %v453_v0 = vadd.f32 %v1043_v34, %v452_v62  ;;  %v493_v1 = vadd.f32 %v1043_v34, %v492_v63  ;;  %v375_v2 = vpop.f32.mrf.mxu0  ;;  %v415_v3 = vpop.f32.mrf.mxu1 }
  0xc4   :  { %v376_v4 = vadd.f32 %v1043_v34, %v375_v2  ;;  %v416_v5 = vadd.f32 %v1043_v34, %v415_v3 }
  0xc5   :  { %v554_v6 = vmax.f32 %v453_v0, 0.0  ;;  %v570_v7 = vmax.f32 %v493_v1, 0.0 }
  0xc6   :  { %v523_v8 = vmax.f32 %v376_v4, 0.0  ;;  %v539_v9 = vmax.f32 %v416_v5, 0.0 }
  0xc7   :  { %618 = vst [vmem:[#allocation2 + $0x138] sm:$0xff] %v554_v6 }
  0xc8   :  { %634 = vst [vmem:[#allocation2 + $0x1b8] sm:$0xff] %v570_v7 }
  0xc9   :  { %587 = vst [vmem:[#allocation2 + $0x40] sm:$0xff] %v523_v8 }
  0xca   :  { %603 = vst [vmem:[#allocation2 + $0xc0] sm:$0xff] %v539_v9  ;;  %v455_v10 = vpop.f32.mrf.mxu2  ;;  %v495_v11 = vpop.f32.mrf.mxu3 }
  0xcb   :  { %v456_v12 = vadd.f32 %v1043_v34, %v455_v10  ;;  %v496_v13 = vadd.f32 %v1043_v34, %v495_v11  ;;  %v377_v14 = vpop.f32.mrf.mxu0  ;;  %v417_v15 = vpop.f32.mrf.mxu1 }
  0xcc   :  { %v378_v16 = vadd.f32 %v1043_v34, %v377_v14  ;;  %v418_v17 = vadd.f32 %v1043_v34, %v417_v15 }
  0xcd   :  { %v555_v18 = vmax.f32 %v456_v12, 0.0  ;;  %v571_v19 = vmax.f32 %v496_v13, 0.0 }
  0xce   :  { %v524_v20 = vmax.f32 %v378_v16, 0.0  ;;  %v540_v21 = vmax.f32 %v418_v17, 0.0 }
  0xcf   :  { %619 = vst [vmem:[#allocation2 + $0x140] sm:$0xff] %v555_v18 }
  0xd0   :  { %635 = vst [vmem:[#allocation2 + $0x1c0] sm:$0xff] %v571_v19 }
  0xd1   :  { %588 = vst [vmem:[#allocation2 + $0x48] sm:$0xff] %v524_v20 }
  0xd2   :  { %604 = vst [vmem:[#allocation2 + $0xc8] sm:$0xff] %v540_v21  ;;  %v457_v22 = vpop.f32.mrf.mxu2  ;;  %v497_v23 = vpop.f32.mrf.mxu3 }
  0xd3   :  { %v458_v24 = vadd.f32 %v1043_v34, %v457_v22  ;;  %v498_v25 = vadd.f32 %v1043_v34, %v497_v23  ;;  %v380_v26 = vpop.f32.mrf.mxu0  ;;  %v420_v27 = vpop.f32.mrf.mxu1 }
  0xd4   :  { %v381_v28 = vadd.f32 %v1043_v34, %v380_v26  ;;  %v421_v29 = vadd.f32 %v1043_v34, %v420_v27 }
  0xd5   :  { %v556_v30 = vmax.f32 %v458_v24, 0.0  ;;  %v572_v31 = vmax.f32 %v498_v25, 0.0 }
  0xd6   :  { %v525_v32 = vmax.f32 %v381_v28, 0.0  ;;  %v541_v33 = vmax.f32 %v421_v29, 0.0 }
  0xd7   :  { %620 = vst [vmem:[#allocation2 + $0x148] sm:$0xff] %v556_v30 }
  0xd8   :  { %636 = vst [vmem:[#allocation2 + $0x1c8] sm:$0xff] %v572_v31 }
  0xd9   :  { %589 = vst [vmem:[#allocation2 + $0x50] sm:$0xff] %v525_v32 }
  0xda   :  { %605 = vst [vmem:[#allocation2 + $0xd0] sm:$0xff] %v541_v33  ;;  %v460_v35 = vpop.f32.mrf.mxu2  ;;  %v500_v36 = vpop.f32.mrf.mxu3 }
  0xdb   :  { %v461_v37 = vadd.f32 %v1043_v34, %v460_v35  ;;  %v501_v38 = vadd.f32 %v1043_v34, %v500_v36  ;;  %v382_v39 = vpop.f32.mrf.mxu0  ;;  %v422_v40 = vpop.f32.mrf.mxu1 }
  0xdc   :  { %v383_v41 = vadd.f32 %v1043_v34, %v382_v39  ;;  %v423_v42 = vadd.f32 %v1043_v34, %v422_v40 }
  0xdd   :  { %v557_v43 = vmax.f32 %v461_v37, 0.0  ;;  %v573_v44 = vmax.f32 %v501_v38, 0.0 }
  0xde   :  { %v526_v45 = vmax.f32 %v383_v41, 0.0  ;;  %v542_v46 = vmax.f32 %v423_v42, 0.0 }
  0xdf   :  { %621 = vst [vmem:[#allocation2 + $0x150] sm:$0xff] %v557_v43 }
  0xe0   :  { %637 = vst [vmem:[#allocation2 + $0x1d0] sm:$0xff] %v573_v44 }
  0xe1   :  { %590 = vst [vmem:[#allocation2 + $0x58] sm:$0xff] %v526_v45 }
  0xe2   :  { %606 = vst [vmem:[#allocation2 + $0xd8] sm:$0xff] %v542_v46  ;;  %v462_v47 = vpop.f32.mrf.mxu2  ;;  %v502_v48 = vpop.f32.mrf.mxu3 }
  0xe3   :  { %v463_v49 = vadd.f32 %v1043_v34, %v462_v47  ;;  %v503_v50 = vadd.f32 %v1043_v34, %v502_v48  ;;  %v385_v51 = vpop.f32.mrf.mxu0  ;;  %v425_v52 = vpop.f32.mrf.mxu1 }
  0xe4   :  { %v386_v53 = vadd.f32 %v1043_v34, %v385_v51  ;;  %v426_v54 = vadd.f32 %v1043_v34, %v425_v52 }
  0xe5   :  { %v558_v55 = vmax.f32 %v463_v49, 0.0  ;;  %v574_v56 = vmax.f32 %v503_v50, 0.0 }
  0xe6   :  { %v527_v57 = vmax.f32 %v386_v53, 0.0  ;;  %v543_v58 = vmax.f32 %v426_v54, 0.0 }
  0xe7   :  { %622 = vst [vmem:[#allocation2 + $0x158] sm:$0xff] %v558_v55 }
  0xe8   :  { %638 = vst [vmem:[#allocation2 + $0x1d8] sm:$0xff] %v574_v56 }
  0xe9   :  { %591 = vst [vmem:[#allocation2 + $0x60] sm:$0xff] %v527_v57 }
  0xea   :  { %607 = vst [vmem:[#allocation2 + $0xe0] sm:$0xff] %v543_v58  ;;  %v465_v59 = vpop.f32.mrf.mxu2  ;;  %v505_v60 = vpop.f32.mrf.mxu3 }
  0xeb   :  { %v466_v61 = vadd.f32 %v1043_v34, %v465_v59  ;;  %v506_v62 = vadd.f32 %v1043_v34, %v505_v60  ;;  %v387_v63 = vpop.f32.mrf.mxu0  ;;  %v427_v0 = vpop.f32.mrf.mxu1 }
  0xec   :  { %v388_v1 = vadd.f32 %v1043_v34, %v387_v63  ;;  %v428_v2 = vadd.f32 %v1043_v34, %v427_v0 }
  0xed   :  { %v559_v3 = vmax.f32 %v466_v61, 0.0  ;;  %v575_v4 = vmax.f32 %v506_v62, 0.0 }
  0xee   :  { %v528_v5 = vmax.f32 %v388_v1, 0.0  ;;  %v544_v6 = vmax.f32 %v428_v2, 0.0 }
  0xef   :  { %623 = vst [vmem:[#allocation2 + $0x160] sm:$0xff] %v559_v3 }
  0xf0   :  { %639 = vst [vmem:[#allocation2 + $0x1e0] sm:$0xff] %v575_v4 }
  0xf1   :  { %592 = vst [vmem:[#allocation2 + $0x68] sm:$0xff] %v528_v5 }
  0xf2   :  { %608 = vst [vmem:[#allocation2 + $0xe8] sm:$0xff] %v544_v6  ;;  %v467_v7 = vpop.f32.mrf.mxu2  ;;  %v507_v8 = vpop.f32.mrf.mxu3 }
  0xf3   :  { %v468_v9 = vadd.f32 %v1043_v34, %v467_v7  ;;  %v508_v10 = vadd.f32 %v1043_v34, %v507_v8  ;;  %v390_v11 = vpop.f32.mrf.mxu0  ;;  %v430_v12 = vpop.f32.mrf.mxu1 }
  0xf4   :  { %v391_v13 = vadd.f32 %v1043_v34, %v390_v11  ;;  %v431_v14 = vadd.f32 %v1043_v34, %v430_v12 }
  0xf5   :  { %v560_v15 = vmax.f32 %v468_v9, 0.0  ;;  %v576_v16 = vmax.f32 %v508_v10, 0.0 }
  0xf6   :  { %v529_v17 = vmax.f32 %v391_v13, 0.0  ;;  %v545_v18 = vmax.f32 %v431_v14, 0.0 }
  0xf7   :  { %624 = vst [vmem:[#allocation2 + $0x168] sm:$0xff] %v560_v15 }
  0xf8   :  { %640 = vst [vmem:[#allocation2 + $0x1e8] sm:$0xff] %v576_v16 }
  0xf9   :  { %593 = vst [vmem:[#allocation2 + $0x70] sm:$0xff] %v529_v17 }
  0xfa   :  { %609 = vst [vmem:[#allocation2 + $0xf0] sm:$0xff] %v545_v18  ;;  %v470_v19 = vpop.f32.mrf.mxu2  ;;  %v510_v20 = vpop.f32.mrf.mxu3 }
  0xfb   :  { %v471_v21 = vadd.f32 %v1043_v34, %v470_v19  ;;  %v511_v22 = vadd.f32 %v1043_v34, %v510_v20  ;;  %v392_v23 = vpop.f32.mrf.mxu0  ;;  %v432_v24 = vpop.f32.mrf.mxu1 }
  0xfc   :  { %v393_v25 = vadd.f32 %v1043_v34, %v392_v23  ;;  %v433_v26 = vadd.f32 %v1043_v34, %v432_v24 }
  0xfd   :  { %v561_v27 = vmax.f32 %v471_v21, 0.0  ;;  %v577_v28 = vmax.f32 %v511_v22, 0.0 }
  0xfe   :  { %v530_v29 = vmax.f32 %v393_v25, 0.0  ;;  %v546_v30 = vmax.f32 %v433_v26, 0.0 }
  0xff   :  { %625 = vst [vmem:[#allocation2 + $0x170] sm:$0xff] %v561_v27 }
 0x100   :  { %641 = vst [vmem:[#allocation2 + $0x1f0] sm:$0xff] %v577_v28 }
 0x101   :  { %594 = vst [vmem:[#allocation2 + $0x78] sm:$0xff] %v530_v29 }
 0x102   :  { %610 = vst [vmem:[#allocation2 + $0xf8] sm:$0xff] %v546_v30  ;;  %v472_v31 = vpop.f32.mrf.mxu2  ;;  %v512_v32 = vpop.f32.mrf.mxu3 }
 0x103   :  { %v473_v33 = vadd.f32 %v1043_v34, %v472_v31  ;;  %v513_v35 = vadd.f32 %v1043_v34, %v512_v32 }
 0x105   :  { %v562_v36 = vmax.f32 %v473_v33, 0.0  ;;  %v578_v37 = vmax.f32 %v513_v35, 0.0 }
 0x107   :  { %626 = vst [vmem:[#allocation2 + $0x178] sm:$0xff] %v562_v36 }
 0x108   :  { %642 = vst [vmem:[#allocation2 + $0x1f8] sm:$0xff] %v578_v37 }
 0x109   :  { %655 = dma.vmem_to_hbm [thread:$0]  %s648_s2, 8192, %s650_s25, [#allocation3], %s887_s26, %s887_s26, %s888_s27  }
 0x10a   :  { %884 = dma.done.wait [#allocation3], 8192  }
 0x10b   :  { %885 = vsyncadd [#allocation3], 4294959104 }
 0x10c   :  { %660 = vsyncpa [#allocation3], 1 }

</bundles_post_ra>
